<compile_context>
chip_gen: v5e
topology: v5e:2x2
jax: 0.10.0
libtpu: 0.0.40
codegen_flags: <defaults>
</compile_context>

<pallas_src>
import jax
import jax.numpy as jnp
from jax.experimental import pallas as pl
from jax.experimental.pallas import tpu as pltpu

UNIFORM_SIGMA = 3.46


def qfunc_kernel(xT_ref, w1_ref, b1_ref, w2_ref, b2_ref, w3_ref, b3_ref, o_ref):
    """Feature-major MLP: all activations are (features, batch_tile); batch on lanes."""
    # Layer 1 (rescale folded into w1/b1; obs+act already stacked into xT rows).
    h = jnp.dot(w1_ref[...], xT_ref[...], preferred_element_type=jnp.float32) + b1_ref[...]
    h = jnp.maximum(h, 0.0)

    # Layer 2: Linear -> ReLU
    h = jnp.dot(w2_ref[...], h, preferred_element_type=jnp.float32) + b2_ref[...]
    h = jnp.maximum(h, 0.0)

    # Output layer: Linear -> Identity (3 heads), lane-dense store (n_out, TB).
    h = jnp.dot(w3_ref[...], h, preferred_element_type=jnp.float32) + b3_ref[...]
    o_ref[...] = h.astype(o_ref.dtype)


def fold_rescale_into_layer1(W1, b1, lower_bounds, upper_bounds):
    """Exact algebraic fold of RescaleInput into the first Linear layer (done once).

    W1 is (in, out).  Returns W1f (in, out) and b1f (out,).
    """
    lb = lower_bounds.astype(jnp.float32)
    ub = upper_bounds.astype(jnp.float32)
    scale = UNIFORM_SIGMA / (ub - lb)                       # (D,)
    shift = (-lb / (ub - lb) - 0.5) * UNIFORM_SIGMA         # (D,)
    W1f = scale[:, None] * W1.astype(jnp.float32)           # diag(scale) @ W1
    b1f = b1.astype(jnp.float32) + shift @ W1.astype(jnp.float32)
    return W1f, b1f


def _choose_batch_tile(B):
    """Pick a batch (lane) tile size and the padded batch extent."""
    if B <= 256:
        # One full-extent tile; block == array dim so no (8,128) alignment needed.
        return B, B
    # >= 2 grid steps (keeps both v7x TensorCores busy via "parallel"); lane-aligned
    # tiles of at most 4096 lanes.  VMEM use per step stays well under 3 MiB.
    half = pl.cdiv(B, 2)
    TB = min(4096, 128 * pl.cdiv(half, 128))
    Bp = TB * pl.cdiv(B, TB)
    return TB, Bp


def mlp_q_function(obs, act, lower_bounds, upper_bounds, params):
    """params = (W1, b1, W2, b2, W3, b3) with Wi shaped (in, out), bi shaped (out,)."""
    obs = obs.astype(jnp.float32)
    act = act.astype(jnp.float32)
    B, obs_dim = obs.shape
    _, act_dim = act.shape
    W1, b1, W2, b2, W3, b3 = params
    D = obs_dim + act_dim
    H1 = W1.shape[1]
    H2 = W2.shape[1]
    n_out = W3.shape[1]

    # Fold RescaleInput into layer 1, then move everything to feature-major layout.
    W1f, b1f = fold_rescale_into_layer1(W1, b1, lower_bounds, upper_bounds)
    W1T = W1f.T                                             # (H1, D)
    W2T = W2.astype(jnp.float32).T                          # (H2, H1)
    W3T = W3.astype(jnp.float32).T                          # (n_out, H2)
    b1c = b1f.reshape(H1, 1)
    b2c = b2.astype(jnp.float32).reshape(H2, 1)
    b3c = b3.astype(jnp.float32).reshape(n_out, 1)

    # Stack obs/act rows once (7-row copy) and transpose so batch is the lane axis.
    xT = jnp.concatenate([obs, act], axis=-1).T             # (D, B)

    TB, Bp = _choose_batch_tile(B)
    if Bp != B:
        xT = jnp.pad(xT, ((0, 0), (0, Bp - B)))             # padded cols are discarded
    grid = (Bp // TB,)

    # Activations / outputs: tile over batch (lane axis).
    x_spec = pl.BlockSpec((D, TB), lambda i: (0, i))
    out_spec = pl.BlockSpec((n_out, TB), lambda i: (0, i))
    # Weights / biases: same block for every grid step -> VMEM-resident, loaded once.
    resident = lambda shape: pl.BlockSpec(shape, lambda i: (0, 0))

    flops = 2 * B * (D * H1 + H1 * H2 + H2 * n_out)
    param_bytes = 4 * (D * H1 + H1 + H1 * H2 + H2 + H2 * n_out + n_out)
    bytes_accessed = 4 * B * (D + n_out) + param_bytes

    outT = pl.pallas_call(
        qfunc_kernel,
        out_shape=jax.ShapeDtypeStruct((n_out, Bp), jnp.float32),
        grid=grid,
        in_specs=[
            x_spec,
            resident((H1, D)),
            resident((H1, 1)),
            resident((H2, H1)),
            resident((H2, 1)),
            resident((n_out, H2)),
            resident((n_out, 1)),
        ],
        out_specs=out_spec,
        compiler_params=pltpu.CompilerParams(
            dimension_semantics=("parallel",)),
        cost_estimate=pl.CostEstimate(
            flops=flops, transcendentals=0, bytes_accessed=bytes_accessed),
    )(xT, W1T, b1c, W2T, b2c, W3T, b3c)

    # Layout plumbing back to the module's (B, n_out) convention; drop padding.
    return outT[:, :B].T


def init_linear(key, fan_in, fan_out):
    """Deterministic PyTorch-style Linear init: U(-1/sqrt(fan_in), 1/sqrt(fan_in))."""
    kw, kb = jax.random.split(key)
    bound = 1.0 / jnp.sqrt(float(fan_in))
    # Stored as (in, out), i.e. the transpose of torch's (out, in) weight.
    W = jax.random.uniform(kw, (fan_in, fan_out), jnp.float32, -bound, bound)
    b = jax.random.uniform(kb, (fan_out,), jnp.float32, -bound, bound)
    return W, b


def reference_forward(obs, act, lower_bounds, upper_bounds, params):
    """Pure-JAX reference matching the PyTorch forward, for a correctness check."""
    x = jnp.concatenate([obs, act], axis=-1)
    x = ((x - lower_bounds) / (upper_bounds - lower_bounds) - 0.5) * UNIFORM_SIGMA
    W1, b1, W2, b2, W3, b3 = params
    h = jnp.maximum(x @ W1 + b1, 0.0)
    h = jnp.maximum(h @ W2 + b2, 0.0)
    return h @ W3 + b3


if __name__ == "__main__":
    # Small shapes implied by the module: obs_dim=4, act_dim=3, hidden_sizes=(32, 32), 3 heads.
    obs_dim, act_dim = 4, 3
    hidden = (32, 32)
    D = obs_dim + act_dim

    key = jax.random.PRNGKey(0)
    k_obs, k_act, k1, k2, k3 = jax.random.split(key, 5)

    # Deterministic synthetic observation/action space bounds.
    lower_bounds = jnp.concatenate([jnp.full((obs_dim,), -1.0, jnp.float32),
                                    jnp.full((act_dim,), 0.0, jnp.float32)])
    upper_bounds = jnp.concatenate([jnp.full((obs_dim,), 1.0, jnp.float32),
                                    jnp.full((act_dim,), 2.0, jnp.float32)])

    W1, b1 = init_linear(k1, D, hidden[0])
    W2, b2 = init_linear(k2, hidden[0], hidden[1])
    W3, b3 = init_linear(k3, hidden[1], 3)
    params = (W1, b1, W2, b2, W3, b3)

    # Case 1: tiny batch (single full-extent tile).
    B = 8
    obs = jax.random.uniform(k_obs, (B, obs_dim), jnp.float32, -1.0, 1.0)
    act = jax.random.uniform(k_act, (B, act_dim), jnp.float32, 0.0, 2.0)
    out = jax.block_until_ready(mlp_q_function(obs, act, lower_bounds, upper_bounds, params))
    ref = reference_forward(obs, act, lower_bounds, upper_bounds, params)
    assert out.shape == (B, 3)
    assert jnp.allclose(out, ref, atol=1e-4, rtol=1e-4)

    # Case 2: batch not a tile multiple (exercises padding + multi-step grid).
    B2 = 300
    obs2 = jax.random.uniform(k_obs, (B2, obs_dim), jnp.float32, -1.0, 1.0)
    act2 = jax.random.uniform(k_act, (B2, act_dim), jnp.float32, 0.0, 2.0)
    out2 = jax.block_until_ready(mlp_q_function(obs2, act2, lower_bounds, upper_bounds, params))
    ref2 = reference_forward(obs2, act2, lower_bounds, upper_bounds, params)
    assert out2.shape == (B2, 3)
    assert jnp.allclose(out2, ref2, atol=1e-4, rtol=1e-4)

    print("KERNEL_OK")
</pallas_src>

<mosaic_0001>
module attributes {stable_mosaic.version = 11 : i64} {
  func.func @qfunc_kernel(%arg0: i32, %arg1: memref<7x8xf32, #tpu.memory_space<vmem>>, %arg2: memref<32x7xf32, #tpu.memory_space<vmem>>, %arg3: memref<32x1xf32, #tpu.memory_space<vmem>>, %arg4: memref<32x32xf32, #tpu.memory_space<vmem>>, %arg5: memref<32x1xf32, #tpu.memory_space<vmem>>, %arg6: memref<3x32xf32, #tpu.memory_space<vmem>>, %arg7: memref<3x1xf32, #tpu.memory_space<vmem>>, %arg8: memref<3x8xf32, #tpu.memory_space<vmem>>) attributes {dimension_semantics = [#tpu.dimension_semantics<parallel>], iteration_bounds = array<i64: 1>, scalar_prefetch = 0 : i64, scratch_operands = 0 : i64, tpu.core_type = #tpu.core_type<tc>, window_params = [{transform_indices = @transform_0, window_bounds = array<i64: 7, 8>}, {pipeline_mode = #tpu.pipeline_mode<synchronous>, transform_indices = @transform_1, window_bounds = array<i64: 32, 7>}, {pipeline_mode = #tpu.pipeline_mode<synchronous>, transform_indices = @transform_2, window_bounds = array<i64: 32, 1>}, {pipeline_mode = #tpu.pipeline_mode<synchronous>, transform_indices = @transform_3, window_bounds = array<i64: 32, 32>}, {pipeline_mode = #tpu.pipeline_mode<synchronous>, transform_indices = @transform_4, window_bounds = array<i64: 32, 1>}, {pipeline_mode = #tpu.pipeline_mode<synchronous>, transform_indices = @transform_5, window_bounds = array<i64: 3, 32>}, {pipeline_mode = #tpu.pipeline_mode<synchronous>, transform_indices = @transform_6, window_bounds = array<i64: 3, 1>}, {transform_indices = @transform_7, window_bounds = array<i64: 3, 8>}]} {
    %c0 = arith.constant 0 : index
    %c0_0 = arith.constant 0 : index
    %0 = vector.load %arg2[%c0, %c0_0] : memref<32x7xf32, #tpu.memory_space<vmem>>, vector<32x7xf32>
    %c0_1 = arith.constant 0 : index
    %c0_2 = arith.constant 0 : index
    %1 = vector.load %arg1[%c0_1, %c0_2] : memref<7x8xf32, #tpu.memory_space<vmem>>, vector<7x8xf32>
    %cst = arith.constant dense<0.000000e+00> : vector<32x8xf32>
    %2 = tpu.matmul %0, %1, %cst {dimension_numbers = #tpu.dot_dimension_numbers<[1], [0], [0], [1], [0, 0, 1, 1], [], []>} : vector<32x7xf32>, vector<7x8xf32>, vector<32x8xf32> -> vector<32x8xf32>
    %c0_3 = arith.constant 0 : index
    %c0_4 = arith.constant 0 : index
    %3 = vector.load %arg3[%c0_3, %c0_4] : memref<32x1xf32, #tpu.memory_space<vmem>>, vector<32x1xf32>
    %4 = vector.broadcast %3 : vector<32x1xf32> to vector<32x8xf32>
    %5 = arith.addf %2, %4 : vector<32x8xf32>
    %cst_5 = arith.constant 0.000000e+00 : f32
    %6 = vector.broadcast %cst_5 : f32 to vector<32x8xf32>
    %7 = arith.maximumf %5, %6 : vector<32x8xf32>
    %c0_6 = arith.constant 0 : index
    %c0_7 = arith.constant 0 : index
    %8 = vector.load %arg4[%c0_6, %c0_7] : memref<32x32xf32, #tpu.memory_space<vmem>>, vector<32x32xf32>
    %cst_8 = arith.constant dense<0.000000e+00> : vector<32x8xf32>
    %9 = tpu.matmul %8, %7, %cst_8 {dimension_numbers = #tpu.dot_dimension_numbers<[1], [0], [0], [1], [0, 0, 1, 1], [], []>} : vector<32x32xf32>, vector<32x8xf32>, vector<32x8xf32> -> vector<32x8xf32>
    %c0_9 = arith.constant 0 : index
    %c0_10 = arith.constant 0 : index
    %10 = vector.load %arg5[%c0_9, %c0_10] : memref<32x1xf32, #tpu.memory_space<vmem>>, vector<32x1xf32>
    %11 = vector.broadcast %10 : vector<32x1xf32> to vector<32x8xf32>
    %12 = arith.addf %9, %11 : vector<32x8xf32>
    %cst_11 = arith.constant 0.000000e+00 : f32
    %13 = vector.broadcast %cst_11 : f32 to vector<32x8xf32>
    %14 = arith.maximumf %12, %13 : vector<32x8xf32>
    %c0_12 = arith.constant 0 : index
    %c0_13 = arith.constant 0 : index
    %15 = vector.load %arg6[%c0_12, %c0_13] : memref<3x32xf32, #tpu.memory_space<vmem>>, vector<3x32xf32>
    %cst_14 = arith.constant dense<0.000000e+00> : vector<3x8xf32>
    %16 = tpu.matmul %15, %14, %cst_14 {dimension_numbers = #tpu.dot_dimension_numbers<[1], [0], [0], [1], [0, 0, 1, 1], [], []>} : vector<3x32xf32>, vector<32x8xf32>, vector<3x8xf32> -> vector<3x8xf32>
    %c0_15 = arith.constant 0 : index
    %c0_16 = arith.constant 0 : index
    %17 = vector.load %arg7[%c0_15, %c0_16] : memref<3x1xf32, #tpu.memory_space<vmem>>, vector<3x1xf32>
    %18 = vector.broadcast %17 : vector<3x1xf32> to vector<3x8xf32>
    %19 = arith.addf %16, %18 : vector<3x8xf32>
    %c0_17 = arith.constant 0 : index
    %c0_18 = arith.constant 0 : index
    %20 = vector.load %arg8[%c0_17, %c0_18] : memref<3x8xf32, #tpu.memory_space<vmem>>, vector<3x8xf32>
    tpu.vector_store %arg8[%c0_17, %c0_18], %19 {strides = array<i32>} : memref<3x8xf32, #tpu.memory_space<vmem>>, vector<3x8xf32>,
    return
  }
  func.func @transform_0(%arg0: i32) -> (i32, i32) {
    %c0_i32 = arith.constant 0 : i32
    %c0_i32_0 = arith.constant 0 : i32
    return %c0_i32, %arg0 : i32, i32
  }
  func.func @transform_1(%arg0: i32) -> (i32, i32) {
    %c0_i32 = arith.constant 0 : i32
    %c0_i32_0 = arith.constant 0 : i32
    %c0_i32_1 = arith.constant 0 : i32
    return %c0_i32, %c0_i32_0 : i32, i32
  }
  func.func @transform_2(%arg0: i32) -> (i32, i32) {
    %c0_i32 = arith.constant 0 : i32
    %c0_i32_0 = arith.constant 0 : i32
    %c0_i32_1 = arith.constant 0 : i32
    return %c0_i32, %c0_i32_0 : i32, i32
  }
  func.func @transform_3(%arg0: i32) -> (i32, i32) {
    %c0_i32 = arith.constant 0 : i32
    %c0_i32_0 = arith.constant 0 : i32
    %c0_i32_1 = arith.constant 0 : i32
    return %c0_i32, %c0_i32_0 : i32, i32
  }
  func.func @transform_4(%arg0: i32) -> (i32, i32) {
    %c0_i32 = arith.constant 0 : i32
    %c0_i32_0 = arith.constant 0 : i32
    %c0_i32_1 = arith.constant 0 : i32
    return %c0_i32, %c0_i32_0 : i32, i32
  }
  func.func @transform_5(%arg0: i32) -> (i32, i32) {
    %c0_i32 = arith.constant 0 : i32
    %c0_i32_0 = arith.constant 0 : i32
    %c0_i32_1 = arith.constant 0 : i32
    return %c0_i32, %c0_i32_0 : i32, i32
  }
  func.func @transform_6(%arg0: i32) -> (i32, i32) {
    %c0_i32 = arith.constant 0 : i32
    %c0_i32_0 = arith.constant 0 : i32
    %c0_i32_1 = arith.constant 0 : i32
    return %c0_i32, %c0_i32_0 : i32, i32
  }
  func.func @transform_7(%arg0: i32) -> (i32, i32) {
    %c0_i32 = arith.constant 0 : i32
    %c0_i32_0 = arith.constant 0 : i32
    return %c0_i32, %arg0 : i32, i32
  }
}

</mosaic_0001>

<bundles_post_ra>
// kernel: tpu_custom_call.1
= control target key start
LH: loop header
LB: loop body
LE: loop exit
PB: predicated region body
PF: predicated region fallthrough
CT: control target
= control target key end

     0   :  { %vm69_vm0 = vcmask 1046528   ;;  %vm56_vm1 = vcmask 56320   ;;  %v274_v5 = vmov 0   ;;  %s385_s0 = inlined_call_operand.vmem [shape: f32[7,8], index: 0, kind: input, shape index: {}]   ;;  %s386_s1 = inlined_call_operand.vmem [shape: f32[32,7], index: 1, kind: input, shape index: {}]   ;;  %s387_s2 = inlined_call_operand.vmem [shape: f32[32,1], index: 2, kind: input, shape index: {}]   ;;  %s388_s3 = inlined_call_operand.vmem [shape: f32[32,32], index: 3, kind: input, shape index: {}]   ;;  %s389_s4 = inlined_call_operand.vmem [shape: f32[32,1], index: 4, kind: input, shape index: {}]   ;;  %s390_s5 = inlined_call_operand.vmem [shape: f32[3,32], index: 5, kind: input, shape index: {}]   ;;  %s391_s6 = inlined_call_operand.vmem [shape: f32[3,1], index: 6, kind: input, shape index: {}]   ;;  %s392_s7 = inlined_call_operand.hbm [shape: f32[3,8], index: 7, kind: output, shape index: {}]  }
   0x1   :  { %v31_v0 = vld [vmem:[%s385_s0] sm:$0x7f]  ;;  %v30_v2 = vld [vmem:[%s386_s1 + $0x18] sm:$0xff]  ;;  %v33_v4 = vld [vmem:[%s387_s2 + $0x8] sm:$0xff]  ;;  %246 = vset.pattern.permute.xlu1 %v274_v5  ;;  %245 = vset.pattern.permute.xlu0 %v274_v5 }
   0x2   :  { %v27_v1 = vld [vmem:[%s386_s1] sm:$0xff]  ;;  %228 = vmatpush.msk.msra.mxu0 %vm69_vm0, %v31_v0  ;;  %238 = vmatpush.msk.msra.mxu2 %vm69_vm0, %v31_v0  ;;  %v35_v3 = vld [vmem:[%s387_s2 + $0x18] sm:$0xff] }
   0x3   :  { %229 = vmatmul.msk.f32.vlgmr.msra.gmra.mxu0 %vm56_vm1, %v27_v1  ;;  %232 = vmatmul.msk.f32.vlgmr.msra.gmra.mxu2 %vm56_vm1, %v30_v2 }
   0x4   :  { %53 = vperm.xlu0 %245, %v35_v3   ;;  %43 = vperm.xlu1 %246, %v33_v4  }
   0x5   :  { %12 = vsyncpa [#allocation3], 0  ;;  %247 = vset.pattern.permute.xlu2 %v274_v5  ;;  %v28_v6 = vld [vmem:[%s386_s1 + $0x8] sm:$0xff]  ;;  %v34_v7 = vld [vmem:[%s387_s2 + $0x10] sm:$0xff]  ;;  %vm134_vm2 = vcmask 261120   ;;  %s275_s10 = smov [#allocation2]  }
   0x6   :  { %v32_v8 = vld [vmem:[%s387_s2] sm:$0xff]  ;;  %v29_v9 = vld [vmem:[%s386_s1 + $0x10] sm:$0xff]  ;;  %v111_v10 = vld [vmem:[%s389_s4 + $0x8] sm:$0xff]  ;;  %s217_s0 = sshll.u32 %s275_s10, 4  ;;  %s219_s13 = sshll.u32 %s392_s7, 4  ;;  %vm210_vm3 = vcmask 59392   ;;  %s218_s0 = int_to_ptr.vmem [resolvable:$true] %s217_s0  ;;  %s220_s13 = int_to_ptr.hbm [resolvable:$true] %s219_s13 }
   0x7   :  { %v110_v11 = vld [vmem:[%s389_s4] sm:$0xff]  ;;  %v113_v13 = vld [vmem:[%s389_s4 + $0x18] sm:$0xff]  ;;  %v112_v19 = vld [vmem:[%s389_s4 + $0x10] sm:$0xff] }
   0x8   :  { %131 = vperm.xlu2 %247, %v113_v13   ;;  %v181_v24 = vld [vmem:[%s391_s6] sm:$0x7]  ;;  %v108_v32 = vld [vmem:[%s388_s3 + $0x10] sm:$0xff]  ;;  %v107_v33 = vld [vmem:[%s388_s3 + $0x8] sm:$0xff] }
   0x9   :  { %v106_v31 = vld [vmem:[%s388_s3] sm:$0xff]  ;;  %v109_v34 = vld [vmem:[%s388_s3 + $0x18] sm:$0xff] }
   0xa   :  { %v180_v51 = vld [vmem:[%s390_s5] sm:$0x7] }
   0xb   :  { %230 = vmatmul.msk.f32.gmra.mxu0 %vm56_vm1, %v28_v6 }
   0xc   :  { %48 = vperm.xlu0 %245, %v34_v7   ;;  %38 = vperm.xlu1 %246, %v32_v8  }
  0x10   :  { %126 = vperm.xlu2 %247, %v112_v19  }
  0x13   :  { %231 = vmatmul.msk.f32.gmra.mxu0 %vm56_vm1, %v29_v9 }
  0x14   :  { %121 = vperm.xlu0 %245, %v111_v10   ;;  %116 = vperm.xlu1 %246, %v110_v11  }
  0x18   :  { %184 = vperm.xlu2 %247, %v181_v24  }
  0x62   :  { %v132_v35 = vpop.permute.xlu2 %131 }
  0x6a   :  { %v127_v38 = vpop.permute.xlu2 %126 }
  0x72   :  { %v185_v52 = vpop.permute.xlu2 %184 }
  0x76   :  { %v54_v14 = vpop.permute.xlu0 %53  ;;  %v44_v15 = vpop.permute.xlu1 %43 }
  0x7e   :  { %v49_v21 = vpop.permute.xlu0 %48  ;;  %v39_v22 = vpop.permute.xlu1 %38 }
  0x80   :  { %v90_v12 = vpop.f32.mrf.mxu0 }
  0x81   :  { %v91_v27 = vadd.f32 %v90_v12, %v39_v22 }
  0x83   :  { %v102_v30 = vmax.f32 %v91_v27, 0.0 }
  0x86   :  { %v99_v16 = vpop.f32.mrf.mxu2  ;;  %v122_v43 = vpop.permute.xlu0 %121 }
  0x87   :  { %v100_v18 = vadd.f32 %v99_v16, %v54_v14  ;;  %v117_v46 = vpop.permute.xlu1 %116 }
  0x88   :  { %v93_v17 = vpop.f32.mrf.mxu0 }
  0x89   :  { %v105_v20 = vmax.f32 %v100_v18, 0.0  ;;  %v94_v25 = vadd.f32 %v93_v17, %v44_v15 }
  0x8b   :  { %159 = vmatpush.msra.mxu1 %v105_v20  ;;  %239 = vmatpush.msra.mxu3 %v105_v20  ;;  %v103_v29 = vmax.f32 %v94_v25, 0.0 }
  0x90   :  { %v96_v23 = vpop.f32.mrf.mxu0 }
  0x91   :  { %v97_v26 = vadd.f32 %v96_v23, %v49_v21 }
  0x93   :  { %v104_v28 = vmax.f32 %v97_v26, 0.0 }
  0x95   :  { %160 = vmatpush.msra.mxu1 %v104_v28  ;;  %240 = vmatpush.msra.mxu3 %v104_v28 }
  0x97   :  { %161 = vmatpush.msra.mxu1 %v103_v29  ;;  %241 = vmatpush.msra.mxu3 %v103_v29 }
  0x99   :  { %162 = vmatpush.msra.mxu1 %v102_v30  ;;  %242 = vmatpush.msra.mxu3 %v102_v30 }
  0x9a   :  { %233 = vmatmul.msk.f32.vlgmr.msra.gmra.mxu1 %vm134_vm2, %v106_v31  ;;  %235 = vmatmul.msk.f32.vlgmr.msra.gmra.mxu3 %vm134_vm2, %v108_v32 }
  0xa2   :  { %234 = vmatmul.msk.f32.gmra.mxu1 %vm134_vm2, %v107_v33  ;;  %236 = vmatmul.msk.f32.gmra.mxu3 %vm134_vm2, %v109_v34 }
 0x117   :  { %v164_v36 = vpop.f32.mrf.mxu1 }
 0x118   :  { %v165_v47 = vadd.f32 %v164_v36, %v117_v46 }
 0x11a   :  { %v176_v50 = vmax.f32 %v165_v47, 0.0 }
 0x11d   :  { %v170_v37 = vpop.f32.mrf.mxu3 }
 0x11e   :  { %v171_v41 = vadd.f32 %v170_v37, %v127_v38 }
 0x11f   :  { %v167_v39 = vpop.f32.mrf.mxu1 }
 0x120   :  { %v168_v44 = vadd.f32 %v167_v39, %v122_v43  ;;  %v178_v48 = vmax.f32 %v171_v41, 0.0 }
 0x122   :  { %v177_v49 = vmax.f32 %v168_v44, 0.0 }
 0x125   :  { %v173_v40 = vpop.f32.mrf.mxu3 }
 0x126   :  { %v174_v42 = vadd.f32 %v173_v40, %v132_v35 }
 0x128   :  { %v179_v45 = vmax.f32 %v174_v42, 0.0 }
 0x12a   :  { %202 = vmatpush.msrb.mxu2 %v179_v45 }
 0x12c   :  { %203 = vmatpush.msrb.mxu2 %v178_v48 }
 0x12e   :  { %204 = vmatpush.msrb.mxu2 %v177_v49 }
 0x130   :  { %205 = vmatpush.msrb.mxu2 %v176_v50 }
 0x131   :  { %237 = vmatmul.msk.f32.vlgmr.msrb.gmra.mxu2 %vm134_vm2, %v180_v51 }
 0x1b4   :  { %v207_v53 = vpop.f32.mrf.mxu2 }
 0x1b5   :  { %v208_v54 = vadd.f32 %v207_v53, %v185_v52 }
 0x1b7   :  { %211 = vst.msk [vmem:[#allocation2] sm:$0x7] %vm210_vm3, %v208_v54 }
 0x1b8   :  { %222 = dma.vmem_to_hbm [thread:$0]  %s218_s0, 64, %s220_s13, [#allocation3]  }
 0x1b9   :  { %272 = dma.done.wait [#allocation3], 64  }
 0x1ba   :  { %273 = vsyncadd [#allocation3], 4294967232 }
 0x1bb   :  { %227 = vsyncpa [#allocation3], 1 }

</bundles_post_ra>
